<compile_context>
chip_gen: v6e
topology: v6e:2x2x1
jax: 0.10.0
libtpu: 0.0.40
codegen_flags: <defaults>
</compile_context>

<pallas_src>
import jax
import jax.numpy as jnp
from jax.experimental import pallas as pl
from jax.experimental.pallas import tpu as pltpu


def _cdiv_py(a, b):
    return -(-a // b)


def _default_tile_bytes():
    """Per-chip VMEM block size for the staged copy path (trace time only)."""
    try:
        kind = jax.devices()[0].device_kind.lower()
    except Exception:
        kind = ""
    if "v7" in kind:
        # 3.2 TB/s HBM: larger blocks amortize the ~0.35us/step overhead;
        # 4 buffers * 8 MiB = 32 MiB still leaves >30 MiB of the 64 MiB VMEM.
        return 8 * 1024 * 1024
    if "v6" in kind:
        return 4 * 1024 * 1024
    # v5e: 4 double-buffered 2 MiB blocks = 8 MiB fits the 16 MiB scoped default.
    return 2 * 1024 * 1024


def pallas_identity(x):
    """Materialized identity copy via chunked HBM->HBM DMA (no VMEM staging)."""
    if x.size == 0:
        return x
    if x.ndim == 0:
        return pallas_identity(x.reshape(1, 1)).reshape(x.shape)

    itemsize = jnp.dtype(x.dtype).itemsize
    rows = x.shape[0]
    row_bytes = (x.size // rows) * itemsize
    # A few large overlapped chunks keep multiple DMA engines busy without
    # fragmenting the copy; never split below ~4 MiB of data per chunk.
    min_chunk_rows = max(1, (4 * 1024 * 1024) // max(1, row_bytes))
    n_chunks = max(1, min(4, rows, _cdiv_py(rows, min_chunk_rows)))
    chunk_rows = _cdiv_py(rows, n_chunks)
    chunks = []
    for c in range(n_chunks):
        start = c * chunk_rows
        size = min(chunk_rows, rows - start)
        if size > 0:
            chunks.append((start, size))

    def kernel(x_hbm, o_hbm, sems):
        # Issue all chunk DMAs (overlapped across DMA engines), then wait.
        for c, (start, size) in enumerate(chunks):
            pltpu.make_async_copy(
                x_hbm.at[pl.ds(start, size)],
                o_hbm.at[pl.ds(start, size)],
                sems.at[c],
            ).start()
        for c, (start, size) in enumerate(chunks):
            pltpu.make_async_copy(
                x_hbm.at[pl.ds(start, size)],
                o_hbm.at[pl.ds(start, size)],
                sems.at[c],
            ).wait()

    nbytes = x.size * itemsize
    # Note: pass input_output_aliases={0: 0} (with donation at the jit
    # boundary) if the caller can donate x; XLA can then elide the copy.
    # TODO(synk): on v7x, shard the chunks across the two TensorCores via
    # pl.core_map over a 2-TC mesh to use both cores' DMA-issue capacity.
    return pl.pallas_call(
        kernel,
        out_shape=jax.ShapeDtypeStruct(x.shape, x.dtype),
        in_specs=[pl.BlockSpec(memory_space=pl.ANY)],
        out_specs=pl.BlockSpec(memory_space=pl.ANY),
        scratch_shapes=[pltpu.SemaphoreType.DMA((len(chunks),))],
        cost_estimate=pl.CostEstimate(
            flops=0, transcendentals=0, bytes_accessed=2 * nbytes),
    )(x)


def _copy_kernel(x_ref, o_ref):
    # Pure pass-through: load the current lane-dense tile and store it.
    o_ref[...] = x_ref[...]


def pallas_identity_vmem(x, tile_bytes=None, donate=False):
    """Materialized identity copy staged through VMEM (lane-dense 2-D slab)."""
    size = x.size
    if size == 0:
        return x
    # Widest lane-dense width (multiple of 128) that divides the flat size.
    lane = None
    for cand in (4096, 2048, 1024, 512, 256, 128):
        if size % cand == 0:
            lane = cand
            break
    if lane is None:
        # Flat size not a multiple of 128: the DMA memcpy handles any shape
        # with no masked-store penalty, so use it instead of masked vst.msk.
        return pallas_identity(x)

    itemsize = jnp.dtype(x.dtype).itemsize
    tile_bytes = int(tile_bytes) if tile_bytes else _default_tile_bytes()
    rows = size // lane
    row_bytes = lane * itemsize
    bn = max(1, tile_bytes // row_bytes)
    if bn >= rows:
        bn = rows                      # single block == full dims (always legal)
    else:
        bn = max(8, (bn // 8) * 8)     # (8,128)-aligned blocks; cdiv masks the tail
    grid = (_cdiv_py(rows, bn),)
    block_bytes = bn * row_bytes

    x2 = x.reshape(rows, lane)         # free row-major collapse
    out2 = pl.pallas_call(
        _copy_kernel,
        out_shape=jax.ShapeDtypeStruct((rows, lane), x.dtype),
        grid_spec=pltpu.PrefetchScalarGridSpec(
            num_scalar_prefetch=0,
            grid=grid,
            in_specs=[pl.BlockSpec((bn, lane), lambda i: (i, 0))],
            out_specs=pl.BlockSpec((bn, lane), lambda i: (i, 0)),
        ),
        compiler_params=pltpu.CompilerParams(
            dimension_semantics=("parallel",),
            # Explicit budget: 2 in + 2 out double-buffered blocks + headroom.
            vmem_limit_bytes=4 * block_bytes + (8 << 20),
        ),
        cost_estimate=pl.CostEstimate(
            flops=0, transcendentals=0, bytes_accessed=2 * size * itemsize),
        input_output_aliases=({0: 0} if donate else {}),
    )(x2)
    return out2.reshape(x.shape)


class PrintModulePallas:
    """JAX/Pallas equivalent of the PyTorch PrintModule (no parameters)."""

    def __init__(self, msg, materialize=False):
        self.msg = msg
        self.materialize = materialize

    def __call__(self, x):
        # Matches PyTorch: print(msg, input.shape), then return input unchanged.
        # TODO(synk): under jax.jit this host print fires at trace time only;
        # use jax.debug.print / io_callback if per-step printing is required.
        print(self.msg, tuple(x.shape))
        if self.materialize:
            return pallas_identity(x)
        # Hot path: pure identity -> zero data movement, no kernel launch.
        return x


if __name__ == "__main__":
    key = jax.random.PRNGKey(0)
    # Small NCHW input consistent with typical usage of PrintModule in a CNN.
    x = jax.random.normal(key, (2, 4, 16, 16), dtype=jnp.float32)

    # Module semantics: print + identity pass-through (no kernel on hot path).
    mod = PrintModulePallas("PrintModule input:")
    y = jax.block_until_ready(mod(x))
    assert y.shape == x.shape and y.dtype == x.dtype
    assert bool(jnp.array_equal(y, x))

    # Opt-in materialized copy #1: chunked HBM->HBM DMA memcpy.
    y_dma = jax.block_until_ready(pallas_identity(x))
    assert y_dma.shape == x.shape and y_dma.dtype == x.dtype
    assert bool(jnp.array_equal(y_dma, x))

    # Opt-in materialized copy #2: lane-dense VMEM-staged streaming copy.
    y_vmem = jax.block_until_ready(pallas_identity_vmem(x))
    assert y_vmem.shape == x.shape and y_vmem.dtype == x.dtype
    assert bool(jnp.array_equal(y_vmem, x))

    print("KERNEL_OK")
</pallas_src>

<mosaic_0001>
module attributes {stable_mosaic.version = 11 : i64} {
  func.func @kernel(%arg0: memref<2x4x16x16xf32, #tpu.memory_space<any>>, %arg1: memref<2x4x16x16xf32, #tpu.memory_space<any>>, %arg2: memref<1x!tpu.dma_semaphore, #tpu.memory_space<semaphore_mem>>) attributes {dimension_semantics = [], scalar_prefetch = 0 : i64, scratch_operands = 1 : i64, tpu.core_type = #tpu.core_type<tc>} {
    %c0_i32 = arith.constant 0 : i32
    %c0_i32_0 = arith.constant 0 : i32
    %c0_i32_1 = arith.constant 0 : i32
    %c0_i32_2 = arith.constant 0 : i32
    %c0_i32_3 = arith.constant 0 : i32
    %0 = tpu.memref_slice %arg0[%c0_i32_0, %c0_i32_1, %c0_i32_2, %c0_i32_3] : memref<2x4x16x16xf32, #tpu.memory_space<any>> -> memref<2x4x16x16xf32, #tpu.memory_space<any>>
    %c0_i32_4 = arith.constant 0 : i32
    %c0_i32_5 = arith.constant 0 : i32
    %c0_i32_6 = arith.constant 0 : i32
    %c0_i32_7 = arith.constant 0 : i32
    %1 = tpu.memref_slice %arg1[%c0_i32_4, %c0_i32_5, %c0_i32_6, %c0_i32_7] : memref<2x4x16x16xf32, #tpu.memory_space<any>> -> memref<2x4x16x16xf32, #tpu.memory_space<any>>
    %2 = tpu.memref_slice %arg2[%c0_i32] : memref<1x!tpu.dma_semaphore, #tpu.memory_space<semaphore_mem>> -> memref<1x!tpu.dma_semaphore, #tpu.memory_space<semaphore_mem>>
    %3 = tpu.memref_squeeze %2 : memref<1x!tpu.dma_semaphore, #tpu.memory_space<semaphore_mem>> -> memref<!tpu.dma_semaphore, #tpu.memory_space<semaphore_mem>>
    tpu.enqueue_dma source(%0 : memref<2x4x16x16xf32, #tpu.memory_space<any>>) target(%1 : memref<2x4x16x16xf32, #tpu.memory_space<any>>) target_semaphore(%3 : memref<!tpu.dma_semaphore, #tpu.memory_space<semaphore_mem>>)
    %c0_i32_8 = arith.constant 0 : i32
    %c0_i32_9 = arith.constant 0 : i32
    %c0_i32_10 = arith.constant 0 : i32
    %c0_i32_11 = arith.constant 0 : i32
    %c0_i32_12 = arith.constant 0 : i32
    %4 = tpu.memref_slice %arg0[%c0_i32_9, %c0_i32_10, %c0_i32_11, %c0_i32_12] : memref<2x4x16x16xf32, #tpu.memory_space<any>> -> memref<2x4x16x16xf32, #tpu.memory_space<any>>
    %c0_i32_13 = arith.constant 0 : i32
    %c0_i32_14 = arith.constant 0 : i32
    %c0_i32_15 = arith.constant 0 : i32
    %c0_i32_16 = arith.constant 0 : i32
    %5 = tpu.memref_slice %arg1[%c0_i32_13, %c0_i32_14, %c0_i32_15, %c0_i32_16] : memref<2x4x16x16xf32, #tpu.memory_space<any>> -> memref<2x4x16x16xf32, #tpu.memory_space<any>>
    %6 = tpu.memref_slice %arg2[%c0_i32_8] : memref<1x!tpu.dma_semaphore, #tpu.memory_space<semaphore_mem>> -> memref<1x!tpu.dma_semaphore, #tpu.memory_space<semaphore_mem>>
    %7 = tpu.memref_squeeze %6 : memref<1x!tpu.dma_semaphore, #tpu.memory_space<semaphore_mem>> -> memref<!tpu.dma_semaphore, #tpu.memory_space<semaphore_mem>>
    tpu.wait_dma2 semaphore(%7 : memref<!tpu.dma_semaphore, #tpu.memory_space<semaphore_mem>>) src(%4 : memref<2x4x16x16xf32, #tpu.memory_space<any>>) dst(%5 : memref<2x4x16x16xf32, #tpu.memory_space<any>>)
    return
  }
}

</mosaic_0001>

<bundles_post_ra>
// kernel: tpu_custom_call.1
= control target key start
LH: loop header
LB: loop body
LE: loop exit
PB: predicated region body
PF: predicated region fallthrough
CT: control target
= control target key end

     0   :  { %s30_s6 = smov [#allocation2]   ;;  %s31_s7 = smov 131072   ;;  %s49_s0 = inlined_call_operand.hbm [shape: f32[2,4,16,16], index: 0, kind: input, shape index: {}]   ;;  %s50_s1 = inlined_call_operand.hbm [shape: f32[2,4,16,16], index: 1, kind: output, shape index: {}]  }
   0x1   :  { %s32_s8 = smov 0  }
   0x2   :  { %12 = dma.general %s49_s0, 2048, %s50_s1, %s30_s6, %s31_s7, [#allocation4], %s32_s8, 0  }
   0x3   :  { %28 = dma.done.wait [#allocation2], 2048 }
   0x4   :  { %29 = vsyncadd [#allocation2], 4294965248 }
   0x5   :  { %18 = vsyncmov [#allocation2] }
   0x8   :  { %s19_s13 = vpop.sfrf %18 }
   0x9   :  { %p24_p0 = scmp.ne.s32.totalorder %s19_s13, 0 }
   0xb   :  { %23 = shalt.err (%p24_p0)  }

</bundles_post_ra>
